<compile_context>
chip_gen: v7x
topology: tpu7x:2x2x1
jax: 0.10.0
libtpu: 0.0.40
codegen_flags: <defaults>
</compile_context>

<pallas_src>
import functools
from typing import Optional, Tuple, Union

import jax
import jax.numpy as jnp
from jax.experimental import pallas as pl
from jax.experimental.pallas import tpu as pltpu


def _upsample_kernel(x_ref, o_ref, *, h_in, h_out, w_in, w_out):
    # x_ref: (NC_BLK*H_in,  W_in)   flattened (plane, row) x width
    # o_ref: (NC_BLK*H_out, W_out)
    dt = x_ref.dtype
    m_in = x_ref.shape[0]
    m_out = o_ref.shape[0]

    # Width selector (transposed): sel_wT[wi, wo] = (wi == floor(wo*W_in/W_out)),
    # built with iota + integer inequalities (no integer division needed):
    #   wi == floor(wo*W_in/W_out)  <=>  wi*W_out <= wo*W_in < (wi+1)*W_out
    wi = jax.lax.broadcasted_iota(jnp.int32, (w_in, w_out), 0)
    wo = jax.lax.broadcasted_iota(jnp.int32, (w_in, w_out), 1)
    pw = wo * w_in
    sel_wt = ((wi * w_out <= pw) & (pw < (wi + 1) * w_out)).astype(dt)

    # Flattened-row selector: rows are (plane, h) pairs.  Because each block
    # holds whole planes, the per-plane nearest map extends directly to the
    # flattened row index: src_row = floor(out_row * H_in / H_out).
    ro = jax.lax.broadcasted_iota(jnp.int32, (m_out, m_in), 0)
    ri = jax.lax.broadcasted_iota(jnp.int32, (m_out, m_in), 1)
    ph = ro * h_in
    sel_h = ((ri * h_out <= ph) & (ph < (ri + 1) * h_out)).astype(dt)

    # Width expansion on the MXU, then row expansion on the MXU.
    tmp = jnp.dot(x_ref[...], sel_wt, preferred_element_type=jnp.float32)
    # tmp holds exact copies of input values (one-hot selection), so casting
    # back to the input dtype is lossless and keeps the MXU fed at input
    # precision (matters for bf16 on v5e).
    out = jnp.dot(sel_h, tmp.astype(dt), preferred_element_type=jnp.float32)
    o_ref[...] = out.astype(o_ref.dtype)


def _pick_nc_block(nc: int, h_in: int, w_in: int, h_out: int, w_out: int,
                   itemsize: int) -> int:
    """Largest group of whole (n, c) planes per grid step that is layout-legal,
    fits comfortably in scoped VMEM, and (if possible) leaves >= 2 grid steps."""
    budget = 24 * 1024 * 1024  # conservative for all gens (incl. v7x 64 MiB VMEM)
    lane = 128

    def fits(blk: int) -> bool:
        in_tile = blk * h_in * max(w_in, lane) * itemsize
        out_tile = blk * h_out * max(w_out, lane) * itemsize
        sel = (blk * h_out) * (blk * h_in) * 4 + w_in * max(w_out, lane) * 4
        inter = blk * h_in * max(w_out, lane) * 4
        return 2 * (in_tile + out_tile) + sel + inter <= budget

    def legal(blk: int) -> bool:
        if nc % blk:
            return False
        if blk == nc:
            return True  # block shape == full array dims -> always legal
        return (blk * h_in) % 8 == 0 and (blk * h_out) % 8 == 0

    for blk in range(nc // 2, 0, -1):  # keep >= 2 grid steps (v7x: 2 TCs)
        if legal(blk) and fits(blk):
            return blk
    return nc  # single full block fallback


@functools.partial(jax.jit, static_argnames=("size", "scale_factor"))
def upsampling_nearest2d(
    x: jax.Array,
    size: Optional[Tuple[int, int]] = None,
    scale_factor: Optional[Union[float, Tuple[float, float]]] = None,
) -> jax.Array:
    if size is None and scale_factor is None:
        raise ValueError("upsampling_nearest2d: give either `size` or `scale_factor`.")
    N, C, H_in, W_in = x.shape
    if size is not None:
        H_out, W_out = int(size[0]), int(size[1])
    else:
        if isinstance(scale_factor, (tuple, list)):
            sh, sw = float(scale_factor[0]), float(scale_factor[1])
        else:
            sh = sw = float(scale_factor)
        H_out, W_out = int(H_in * sh), int(W_in * sw)

    nc = N * C
    blk = _pick_nc_block(nc, H_in, W_in, H_out, W_out, x.dtype.itemsize)
    grid = (nc // blk,)

    # Free, contiguous views of the NCHW buffer.
    x2d = x.reshape(nc * H_in, W_in)

    kernel = functools.partial(
        _upsample_kernel, h_in=H_in, h_out=H_out, w_in=W_in, w_out=W_out
    )
    out2d = pl.pallas_call(
        kernel,
        out_shape=jax.ShapeDtypeStruct((nc * H_out, W_out), x.dtype),
        grid_spec=pltpu.PrefetchScalarGridSpec(
            num_scalar_prefetch=0,
            grid=grid,
            in_specs=[pl.BlockSpec((blk * H_in, W_in), lambda i: (i, 0))],
            out_specs=pl.BlockSpec((blk * H_out, W_out), lambda i: (i, 0)),
        ),
        compiler_params=pltpu.CompilerParams(dimension_semantics=("parallel",)),
    )(x2d)
    return out2d.reshape(N, C, H_out, W_out)


def _reference(x, size=None, scale_factor=None):
    N, C, H_in, W_in = x.shape
    if size is not None:
        H_out, W_out = size
    else:
        H_out, W_out = int(H_in * scale_factor[0]), int(W_in * scale_factor[1])
    src_h = jnp.minimum((jnp.arange(H_out, dtype=jnp.int32) * H_in) // H_out, H_in - 1)
    src_w = jnp.minimum((jnp.arange(W_out, dtype=jnp.int32) * W_in) // W_out, W_in - 1)
    return x[:, :, src_h, :][:, :, :, src_w]


if __name__ == "__main__":
    key = jax.random.PRNGKey(0)
    x = jax.random.normal(key, (2, 4, 16, 16), dtype=jnp.float32)

    # scale_factor=2 case (like UpsamplingNearest2d(scale_factor=2))
    y = upsampling_nearest2d(x, size=None, scale_factor=(2.0, 2.0))
    jax.block_until_ready(y)
    assert y.shape == (2, 4, 32, 32), y.shape
    ref = _reference(x, scale_factor=(2.0, 2.0))
    assert jnp.allclose(y, ref, atol=1e-6), "mismatch vs reference (scale_factor)"

    # size=(24, 40) case (like UpsamplingNearest2d(size=(24, 40)))
    y2 = upsampling_nearest2d(x, size=(24, 40), scale_factor=None)
    jax.block_until_ready(y2)
    assert y2.shape == (2, 4, 24, 40), y2.shape
    ref2 = _reference(x, size=(24, 40))
    assert jnp.allclose(y2, ref2, atol=1e-6), "mismatch vs reference (size)"

    print("KERNEL_OK")
</pallas_src>

<mosaic_0001>
module attributes {stable_mosaic.version = 11 : i64} {
  func.func @_upsample_kernel(%arg0: i32, %arg1: memref<64x16xf32, #tpu.memory_space<vmem>>, %arg2: memref<128x32xf32, #tpu.memory_space<vmem>>) attributes {dimension_semantics = [#tpu.dimension_semantics<parallel>], iteration_bounds = array<i64: 2>, scalar_prefetch = 0 : i64, scratch_operands = 0 : i64, tpu.core_type = #tpu.core_type<tc>, window_params = [{transform_indices = @transform_0, window_bounds = array<i64: 64, 16>}, {transform_indices = @transform_1, window_bounds = array<i64: 128, 32>}]} {
    %0 = tpu.iota {dimensions = array<i32: 0>} : vector<16x32xi32>
    %1 = tpu.iota {dimensions = array<i32: 1>} : vector<16x32xi32>
    %c16_i32 = arith.constant 16 : i32
    %2 = vector.broadcast %c16_i32 : i32 to vector<16x32xi32>
    %3 = arith.muli %1, %2 : vector<16x32xi32>
    %c32_i32 = arith.constant 32 : i32
    %4 = vector.broadcast %c32_i32 : i32 to vector<16x32xi32>
    %5 = arith.muli %0, %4 : vector<16x32xi32>
    %6 = arith.cmpi sle, %5, %3 : vector<16x32xi32>
    %c1_i32 = arith.constant 1 : i32
    %7 = vector.broadcast %c1_i32 : i32 to vector<16x32xi32>
    %8 = arith.addi %0, %7 : vector<16x32xi32>
    %c32_i32_0 = arith.constant 32 : i32
    %9 = vector.broadcast %c32_i32_0 : i32 to vector<16x32xi32>
    %10 = arith.muli %8, %9 : vector<16x32xi32>
    %11 = arith.cmpi slt, %3, %10 : vector<16x32xi32>
    %12 = arith.andi %6, %11 : vector<16x32xi1>
    %13 = arith.extui %12 : vector<16x32xi1> to vector<16x32xi32>
    %14 = arith.sitofp %13 : vector<16x32xi32> to vector<16x32xf32>
    %15 = tpu.iota {dimensions = array<i32: 0>} : vector<128x64xi32>
    %16 = tpu.iota {dimensions = array<i32: 1>} : vector<128x64xi32>
    %c16_i32_1 = arith.constant 16 : i32
    %17 = vector.broadcast %c16_i32_1 : i32 to vector<128x64xi32>
    %18 = arith.muli %15, %17 : vector<128x64xi32>
    %c32_i32_2 = arith.constant 32 : i32
    %19 = vector.broadcast %c32_i32_2 : i32 to vector<128x64xi32>
    %20 = arith.muli %16, %19 : vector<128x64xi32>
    %21 = arith.cmpi sle, %20, %18 : vector<128x64xi32>
    %c1_i32_3 = arith.constant 1 : i32
    %22 = vector.broadcast %c1_i32_3 : i32 to vector<128x64xi32>
    %23 = arith.addi %16, %22 : vector<128x64xi32>
    %c32_i32_4 = arith.constant 32 : i32
    %24 = vector.broadcast %c32_i32_4 : i32 to vector<128x64xi32>
    %25 = arith.muli %23, %24 : vector<128x64xi32>
    %26 = arith.cmpi slt, %18, %25 : vector<128x64xi32>
    %27 = arith.andi %21, %26 : vector<128x64xi1>
    %28 = arith.extui %27 : vector<128x64xi1> to vector<128x64xi32>
    %29 = arith.sitofp %28 : vector<128x64xi32> to vector<128x64xf32>
    %c0 = arith.constant 0 : index
    %c0_5 = arith.constant 0 : index
    %30 = vector.load %arg1[%c0, %c0_5] : memref<64x16xf32, #tpu.memory_space<vmem>>, vector<64x16xf32>
    %cst = arith.constant dense<0.000000e+00> : vector<64x32xf32>
    %31 = tpu.matmul %30, %14, %cst {dimension_numbers = #tpu.dot_dimension_numbers<[1], [0], [0], [1], [0, 0, 1, 1], [], []>} : vector<64x16xf32>, vector<16x32xf32>, vector<64x32xf32> -> vector<64x32xf32>
    %cst_6 = arith.constant dense<0.000000e+00> : vector<128x32xf32>
    %32 = tpu.matmul %29, %31, %cst_6 {dimension_numbers = #tpu.dot_dimension_numbers<[1], [0], [0], [1], [0, 0, 1, 1], [], []>} : vector<128x64xf32>, vector<64x32xf32>, vector<128x32xf32> -> vector<128x32xf32>
    %c0_7 = arith.constant 0 : index
    %c0_8 = arith.constant 0 : index
    %33 = vector.load %arg2[%c0_7, %c0_8] : memref<128x32xf32, #tpu.memory_space<vmem>>, vector<128x32xf32>
    tpu.vector_store %arg2[%c0_7, %c0_8], %32 {strides = array<i32>} : memref<128x32xf32, #tpu.memory_space<vmem>>, vector<128x32xf32>,
    return
  }
  func.func @transform_0(%arg0: i32) -> (i32, i32) {
    %c0_i32 = arith.constant 0 : i32
    %c0_i32_0 = arith.constant 0 : i32
    return %arg0, %c0_i32 : i32, i32
  }
  func.func @transform_1(%arg0: i32) -> (i32, i32) {
    %c0_i32 = arith.constant 0 : i32
    %c0_i32_0 = arith.constant 0 : i32
    return %arg0, %c0_i32 : i32, i32
  }
}

</mosaic_0001>

<bundles_post_ra>
// kernel: upsampling_nearest2d.1
= control target key start
LH: loop header
LB: loop body
LE: loop exit
PB: predicated region body
PF: predicated region fallthrough
CT: control target
= control target key end

     0   :  { %6 = vsyncpa [#allocation3], 0  ;;  %s1384_s0 = inlined_call_operand.hbm [shape: f32[128,16], index: 0, kind: input, shape index: {}]   ;;  %s1385_s1 = inlined_call_operand.hbm [shape: f32[256,32], index: 1, kind: output, shape index: {}]  }
   0x1   :  { %8 = vsyncpa [#allocation3 + $0x1], 0 }
   0x2   :  { %9 = vsyncpa [#allocation4], 0 }
   0x3   :  { %11 = vsyncpa [#allocation4 + $0x1], 0  ;;  %s1054_s6 = smov 0   ;;  %s1056_s7 = smov 0  }
   0x4   :  { %s1058_s8 = smov 0   ;;  %s1060_s9 = smov 0  }
   0x5 LB: > { %s1075_s10 = sadd.s32 4294967295, %s1034_s9   ;;  %s708_s11 = sadd.s32 4294967294, %s1034_s9   ;;  %s1034_s9 = sphi %s1060_s9, %s1398_s9   ;;  %s1030_s8 = sphi %s1058_s8, %s1397_s8   ;;  %s1026_s7 = sphi %s1056_s7, %s1396_s7   ;;  %s1022_s6 = sphi %s1054_s6, %s1395_s6  }
   0x6   : > { %s1079_s12 = sadd.s32 1, %s1034_s9   ;;  %s24_s13 = sadd.s32 1, %s1030_s8 }
   0x7   : > { %s21_s14 = ssub.s32 %s1034_s9, %s1079_s12  ;;  %p31_p0 = scmp.ne.s32.totalorder %s1030_s8, %s1026_s7 }
   0x8   : > { %p22_p1 = scmp.eq.s32.totalorder %s21_s14, 0  ;;  %p32_p2 = scmp.eq.s32.totalorder %s1034_s9, 0 }
   0x9   : > { %p37_p3 = scmp.ne.s32.totalorder %s1026_s7, %s1022_s6  ;;  %p38_p4 = scmp.eq.s32.totalorder %s1075_s10, 0 }
   0xa   : > { %s1091_s15 = scalar_select %p22_p1, %s1030_s8, %s24_s13  }
   0xb   : > { %p1093_p5 = por %p32_p2, %p31_p0  ;;  %p1097_p6 = por %p38_p4, %p37_p3 }
   0xc   : > { %p61_p7 = scmp.eq.s32.totalorder %s1075_s10, 1  ;;  %p67_p8 = scmp.eq.s32.totalorder %s708_s11, 1 }
   0xd   : > { %p898_p10 = scmp.lt.s32.totalorder %s1034_s9, 2  ;;  %s87_s20 = sand.u32 1, %s1030_s8  }
   0xe   : > { %p1104_p11 = por %p61_p7, %p31_p0  ;;  %p1108_p12 = por %p67_p8, %p37_p3 }
   0xf   : > { %s766_s21 = sshll.u32 %s1034_s9, 10  ;;  %s711_s22 = sshll.u32 %s87_s20, 6 }
  0x10   : > { %s1389_s18 = scalar_select %p1104_p11, 1, 0 }
  0x11   : > { %s1390_s19 = scalar_select %p1108_p12, 1, 0 }
  0x12   : > { %s1117_s25 = scalar_lea.hbm %s1384_s0, %s766_s21  ;;  %s91_s26 = scalar_lea.vmem [#allocation2], %s711_s22 }
  0x13   : > { %s98_s27 = sshll.u32 %s91_s26, 4  ;;  %p1121_p13 = pnand %p898_p10, %p1093_p5  ;;  %s1125_s27 = int_to_ptr.vmem [resolvable:$true] %s98_s27 }
  0x14   : > { %s1127_s29 = scalar_lea.sflag [#allocation3], %s87_s20  ;;  %s938_s30 = scalar_lea.hbm %s1117_s25, 1024 }
  0x15   : > { %p939_p0 = scmp.ne.s32.totalorder %s1117_s25, %s938_s30  ;;  %p940_p1 = pneg %p1121_p13 }
  0x16   : > { %s943_s4 = scalar_lea.hbm %s1384_s0, 2048  ;;  %p944_p4 = scmp.lt.u32.totalorder %s1117_s25, %s1384_s0 }
  0x17   : > { %p941_p2 = pnand %p940_p1, %p939_p0  ;;  %p945_p5 = scmp.lt.u32.totalorder %s943_s4, %s938_s30 }
  0x18   : > { %p947_p8 = scmp.lt.u32.totalorder %s938_s30, %s1117_s25 }
  0x19   : > { %p942_p3 = pneg %p941_p2  ;;  %p946_p7 = por %p945_p5, %p944_p4 }
  0x1b   : > { %p948_p10 = por %p947_p8, %p946_p7 }
  0x1d   : > { %p949_p9 = pnand %p948_p10, %p942_p3 }
  0x1f   : > { %952 = shalt.err (!%p949_p9)
}
  0x20   : > { %s953_s13 = scalar_lea.vmem %s1125_s27, 1024  ;;  %s1036_s14 = smov [#allocation2]  }
  0x21   : > { %p954_p0 = scmp.ne.s32.totalorder %s1125_s27, %s953_s13  ;;  %s958_s16 = sshll.u32 %s1036_s14, 4  ;;  %s959_s16 = int_to_ptr.vmem [resolvable:$false] %s958_s16 }
  0x22   : > { %s960_s20 = scalar_lea.vmem %s959_s16, 2048  ;;  %p961_p11 = scmp.lt.s32.totalorder %s1125_s27, %s959_s16 }
  0x23   : > { %p956_p2 = pnand %p954_p0, %p940_p1  ;;  %p962_p4 = scmp.lt.s32.totalorder %s960_s20, %s953_s13 }
  0x25   : > { %p957_p12 = pneg %p956_p2  ;;  %p963_p5 = por %p962_p4, %p961_p11 }
  0x27   : > { %p964_p7 = pnand %p963_p5, %p957_p12 }
  0x29   : > { %967 = shalt.err (!%p964_p7)
}
  0x2a   : > { %s1037_s21 = smov 128   ;;  %s1038_s22 = smov 8  }
  0x2b   : > { %893 = dma.hbm_to_vmem [thread:$0]  (!%p1121_p13), %s1117_s25, 1024, %s1125_s27, %s1127_s29, %s1037_s21, %s1037_s21, %s1038_s22  }
  0x2c   : > { %p714_p9 = scmp.ge.s32.totalorder %s1034_s9, 1  ;;  %p106_p1 = scmp.lt.s32.totalorder %s1034_s9, 3 }
  0x2e   : > { %p107_p3 = pnand %p714_p9, %p106_p1 }
  0x2f   : > { %s1158_s23 = sand.u32 (!%p107_p3), 1, %s1026_s7  }
  0x30   : > { %110 = sbr.rel (%p107_p3) target bundleno = 548 (0x224), region = 24  ;;  %s715_s24 = sshll.u32 (!%p107_p3), %s1158_s23, 6 }
  0x31   : > { %s113_s26 = scalar_lea.sflag (!%p107_p3), [#allocation3], %s1158_s23  ;;  %s1162_s30 = scalar_lea.vmem (!%p107_p3), [#allocation2], %s715_s24 }
  0x37   : > { %1013 = dma.done.wait (%p1097_p6), %s113_s26, 1024  }
  0x38   : > { %1015 = vsyncadd (%p1097_p6), %s113_s26, 4294966272  ;;  %v137_v0 = vlaneseq  ;;  %vm280_vm0 = vcmask 130048   ;;  %v272_v10 = vld [vmem:[%s1162_s30] sm:$0xff]  ;;  %v1039_v12 = vmov 1.0|1.0   ;;  %v273_v13 = vld [vmem:[%s1162_s30 + $0x8] sm:$0xff] }
  0x39   : > { %806 = vmatprep.mubr.msk.f32.mxu0 %vm280_vm0, %v272_v10  ;;  %v274_v14 = vld [vmem:[%s1162_s30 + $0x10] sm:$0xff]  ;;  %v275_v15 = vld [vmem:[%s1162_s30 + $0x18] sm:$0xff]  ;;  %v276_v16 = vld [vmem:[%s1162_s30 + $0x20] sm:$0xff]  ;;  %vm410_vm11 = vcmask 523264   ;;  %v1040_v28 = vmov 0.0   ;;  %s716_s17 = sshll.u32 %s1158_s23, 7 }
  0x3a   : > { %v1168_v1 = vshrl.u32 %v137_v0, 7  ;;  %v141_v2 = vand.u32 127, %v137_v0  ;;  %v277_v17 = vld [vmem:[%s1162_s30 + $0x28] sm:$0xff]  ;;  %v278_v18 = vld [vmem:[%s1162_s30 + $0x30] sm:$0xff]  ;;  %v279_v19 = vld [vmem:[%s1162_s30 + $0x38] sm:$0xff]  ;;  %s1299_s25 = scalar_lea.vmem [#allocation5], %s716_s17 }
  0x3b   : > { %s767_s27 = sshll.u32 %s1075_s10, 11  ;;  %s635_s28 = sshll.u32 %s1299_s25, 4  ;;  %s1336_s28 = int_to_ptr.vmem [resolvable:$true] %s635_s28 }
  0x3c   : > { %v1171_v3 = vadd.s32 8, %v1168_v1  ;;  %v142_v4 = vmul.u32 16, %v141_v2  ;;  %v143_v5 = vmul.u32 32, %v1168_v1  ;;  %v147_v6 = vadd.s32 1, %v1168_v1  ;;  %s1334_s3 = scalar_lea.hbm %s1385_s1, %s767_s27  ;;  %s622_s10 = scalar_lea.sflag [#allocation4], %s1158_s23 }
  0x3d   : > { %v206_v20 = vadd.s32 1, %v141_v2  ;;  %v1193_v21 = vmul.u32 32, %v141_v2  ;;  %v163_v23 = vadd.s32 48, %v1168_v1  ;;  %v164_v24 = vadd.s32 56, %v1168_v1  ;;  %s968_s4 = scalar_lea.vmem %s1336_s28, 2048  ;;  %p1392_p11 = scmp.ne.s32.totalorder %s1389_s18, 0 }
  0x3e   : > { %v144_v7 = vmul.u32 32, %v1171_v3  ;;  %vm145_vm1 = vcmp.le.s32.totalorder %v143_v5, %v142_v4  ;;  %v148_v8 = vadd.s32 1, %v1171_v3  ;;  %v149_v9 = vmul.u32 32, %v147_v6  ;;  %p969_p6 = scmp.ne.s32.totalorder %s1336_s28, %s968_s4  ;;  %s1041_s5 = smov [#allocation5]  }
  0x3f   : > { %v1195_v22 = vmul.u32 32, %v206_v20  ;;  %v179_v25 = vmul.u32 16, %v163_v23  ;;  %v165_v27 = vadd.s32 64, %v1168_v1  ;;  %v166_v31 = vadd.s32 72, %v1168_v1  ;;  %s972_s11 = sshll.u32 %s1041_s5, 4  ;;  %s973_s11 = int_to_ptr.vmem [resolvable:$false] %s972_s11 }
  0x40   : > { %vm146_vm2 = vcmp.le.s32.totalorder %v144_v7, %v142_v4  ;;  %v150_v11 = vmul.u32 32, %v148_v8  ;;  %vm151_vm3 = vcmp.lt.s32.totalorder %v142_v4, %v149_v9  ;;  %v180_v26 = vmul.u32 16, %v164_v24  ;;  %p970_p12 = pnand %p969_p6, %p1392_p11  ;;  %s974_s13 = scalar_lea.vmem %s973_s11, 4096 }
  0x41   : > { %vm153_vm4 = vmand %vm145_vm1, %vm151_vm3  ;;  %vm196_vm8 = vcmp.le.s32.totalorder %v1193_v21, %v179_v25  ;;  %vm214_vm9 = vcmp.lt.s32.totalorder %v179_v25, %v1195_v22  ;;  %v181_v30 = vmul.u32 16, %v165_v27  ;;  %v182_v33 = vmul.u32 16, %v166_v31  ;;  %p975_p8 = scmp.lt.s32.totalorder %s1336_s28, %s973_s11  ;;  %p976_p10 = scmp.lt.s32.totalorder %s974_s13, %s968_s4 }
  0x42   : > { %vm152_vm5 = vcmp.lt.s32.totalorder %v142_v4, %v150_v11  ;;  %vm230_vm10 = vmand %vm196_vm8, %vm214_vm9  ;;  %vm197_vm12 = vcmp.le.s32.totalorder %v1193_v21, %v180_v26  ;;  %vm215_vm13 = vcmp.lt.s32.totalorder %v180_v26, %v1195_v22  ;;  %v167_v34 = vadd.s32 80, %v1168_v1  ;;  %p971_p13 = pneg %p970_p12 }
  0x43   : > { %vm154_vm6 = vmand %vm146_vm2, %vm152_vm5  ;;  %v725_v29 = vsel %vm230_vm10, 1.0, %v1040_v28  ;;  %vm198_vm15 = vcmp.le.s32.totalorder %v1193_v21, %v181_v30  ;;  %v173_v35 = vmul.u32 16, %v1168_v1  ;;  %v168_v36 = vadd.s32 88, %v1168_v1  ;;  %p977_p0 = por %p976_p10, %p975_p8 }
  0x44   : > { %vm858_vm7 = vmpackc.low %vm154_vm6, %vm153_vm4  ;;  %843 = vmatprep.mubr.msk.f32.mxu1 %vm410_vm11, %v725_v29  ;;  %vm199_vm2 = vcmp.le.s32.totalorder %v1193_v21, %v182_v33  ;;  %vm217_vm3 = vcmp.lt.s32.totalorder %v182_v33, %v1195_v22  ;;  %v174_v38 = vmul.u32 16, %v1171_v3  ;;  %v183_v39 = vmul.u32 16, %v167_v34 }
  0x45   : > { %859 = vmatprep.subr.msk.bf16.mxu0 %vm858_vm7, %v1039_v12  ;;  %vm231_vm14 = vmand %vm197_vm12, %vm215_vm13  ;;  %vm190_vm5 = vcmp.le.s32.totalorder %v1193_v21, %v173_v35  ;;  %vm208_vm6 = vcmp.lt.s32.totalorder %v173_v35, %v1195_v22  ;;  %v184_v40 = vmul.u32 16, %v168_v36  ;;  %v159_v42 = vadd.s32 16, %v1168_v1  ;;  %p978_p2 = pnand %p977_p0, %p971_p13 }
  0x46   : > { %861 = vmatpush3.bf16.msk.msra.mxu0 %vm858_vm7, %v1039_v12  ;;  %v1208_v32 = vsel %vm231_vm14, 1.0, %v1040_v28  ;;  %vm233_vm4 = vmand %vm199_vm2, %vm217_vm3  ;;  %vm191_vm8 = vcmp.le.s32.totalorder %v1193_v21, %v174_v38  ;;  %vm209_vm9 = vcmp.lt.s32.totalorder %v174_v38, %v1195_v22  ;;  %vm200_vm12 = vcmp.le.s32.totalorder %v1193_v21, %v183_v39 }
  0x47   : > { %v1224_v41 = vsel %vm233_vm4, 1.0, %v1040_v28  ;;  %vm224_vm7 = vmand %vm190_vm5, %vm208_vm6  ;;  %vm218_vm13 = vcmp.lt.s32.totalorder %v183_v39, %v1195_v22  ;;  %vm201_vm14 = vcmp.le.s32.totalorder %v1193_v21, %v184_v40  ;;  %v175_v45 = vmul.u32 16, %v159_v42 }
  0x48   : > { %v719_v43 = vsel %vm224_vm7, 1.0, %v1040_v28  ;;  %vm225_vm10 = vmand %vm191_vm8, %vm209_vm9  ;;  %v160_v46 = vadd.s32 24, %v1168_v1  ;;  %v169_v48 = vadd.s32 96, %v1168_v1  ;;  %v170_v49 = vadd.s32 104, %v1168_v1 }
  0x49   : > { %807 = vmatmul.mubr.msk.f32.vlgmr.msra.gmra.mrb[0].mxu0 %vm280_vm0, %v273_v13  ;;  %v1235_v44 = vsel %vm225_vm10, 1.0, %v1040_v28  ;;  %v161_v50 = vadd.s32 32, %v1168_v1  ;;  %vm192_vm2 = vcmp.le.s32.totalorder %v1193_v21, %v175_v45  ;;  %vm210_vm3 = vcmp.lt.s32.totalorder %v175_v45, %v1195_v22 }
  0x4a   : > { %809 = vmatprep.mubr.msk.f32.mxu0 %vm280_vm0, %v274_v14  ;;  %v176_v52 = vmul.u32 16, %v160_v46  ;;  %vm226_vm4 = vmand %vm192_vm2, %vm210_vm3  ;;  %v185_v53 = vmul.u32 16, %v169_v48  ;;  %v162_v55 = vadd.s32 40, %v1168_v1  ;;  %v171_v56 = vadd.s32 112, %v1168_v1 }
  0x4b   : > { %v186_v54 = vmul.u32 16, %v170_v49  ;;  %v1253_v57 = vsel %vm226_vm4, 1.0, %v1040_v28  ;;  %v177_v58 = vmul.u32 16, %v161_v50  ;;  %v172_v63 = vadd.s32 120, %v1168_v1 }
  0x4c   : > { %vm193_vm5 = vcmp.le.s32.totalorder %v1193_v21, %v176_v52  ;;  %vm211_vm6 = vcmp.lt.s32.totalorder %v176_v52, %v1195_v22  ;;  %vm202_vm8 = vcmp.le.s32.totalorder %v1193_v21, %v185_v53  ;;  %vm220_vm9 = vcmp.lt.s32.totalorder %v185_v53, %v1195_v22 }
  0x4d   : > { %810 = vmatmul.mubr.msk.f32.gmra.mrb[2].mxu0 %vm280_vm0, %v275_v15  ;;  %vm227_vm7 = vmand %vm193_vm5, %vm211_vm6  ;;  %vm203_vm10 = vcmp.le.s32.totalorder %v1193_v21, %v186_v54  ;;  %v178_v60 = vmul.u32 16, %v162_v55  ;;  %v187_v62 = vmul.u32 16, %v171_v56 }
  0x4e   : > { %812 = vmatprep.mubr.msk.f32.mxu0 %vm280_vm0, %v276_v16  ;;  %v722_v59 = vsel %vm227_vm7, 1.0, %v1040_v28  ;;  %v188_v3 = vmul.u32 16, %v172_v63 }
  0x4f   : > { %vm195_vm2 = vcmp.le.s32.totalorder %v1193_v21, %v178_v60  ;;  %vm213_vm3 = vcmp.lt.s32.totalorder %v178_v60, %v1195_v22  ;;  %vm204_vm5 = vcmp.le.s32.totalorder %v1193_v21, %v187_v62  ;;  %vm222_vm6 = vcmp.lt.s32.totalorder %v187_v62, %v1195_v22 }
  0x50   : > { %vm229_vm4 = vmand %vm195_vm2, %vm213_vm3 }
  0x51   : > { %813 = vmatmul.mubr.msk.f32.gmra.mrb[4].mxu0 %vm280_vm0, %v277_v17  ;;  %v724_v4 = vsel %vm229_vm4, 1.0, %v1040_v28  ;;  %vm238_vm7 = vmand %vm204_vm5, %vm222_vm6 }
  0x52   : > { %815 = vmatprep.mubr.msk.f32.mxu0 %vm280_vm0, %v278_v18  ;;  %v733_v1 = vsel %vm238_vm7, 1.0, %v1040_v28 }
  0x55   : > { %816 = vmatmul.mubr.msk.f32.gmra.mrb[6].mxu0 %vm280_vm0, %v279_v19  ;;  %vm216_vm0 = vcmp.lt.s32.totalorder %v181_v30, %v1195_v22 }
  0x56   : > { %vm232_vm1 = vmand %vm198_vm15, %vm216_vm0  ;;  %834 = vmatprep.mubr.msk.f32.mxu0 %vm410_vm11, %v719_v43  ;;  %vm219_vm0 = vcmp.lt.s32.totalorder %v184_v40, %v1195_v22 }
  0x57   : > { %v1216_v37 = vsel %vm232_vm1, 1.0, %v1040_v28  ;;  %vm234_vm15 = vmand %vm200_vm12, %vm218_vm13  ;;  %vm221_vm12 = vcmp.lt.s32.totalorder %v186_v54, %v1195_v22 }
  0x58   : > { %v1240_v47 = vsel %vm234_vm15, 1.0, %v1040_v28  ;;  %vm235_vm1 = vmand %vm201_vm14, %vm219_vm0  ;;  %vm194_vm14 = vcmp.le.s32.totalorder %v1193_v21, %v177_v58  ;;  %vm212_vm15 = vcmp.lt.s32.totalorder %v177_v58, %v1195_v22 }
  0x59   : > { %v1246_v51 = vsel %vm235_vm1, 1.0, %v1040_v28  ;;  %vm236_vm13 = vmand %vm202_vm8, %vm220_vm9  ;;  %vm205_vm8 = vcmp.le.s32.totalorder %v1193_v21, %v188_v3  ;;  %vm223_vm9 = vcmp.lt.s32.totalorder %v188_v3, %v1195_v22 }
  0x5a   : > { %v731_v61 = vsel %vm236_vm13, 1.0, %v1040_v28  ;;  %vm237_vm0 = vmand %vm203_vm10, %vm221_vm12  ;;  %vm604_vm12 = vcmask 261120  }
  0x5b   : > { %v732_v0 = vsel %vm237_vm0, 1.0, %v1040_v28  ;;  %vm228_vm1 = vmand %vm194_vm14, %vm212_vm15 }
  0x5c   : > { %v723_v2 = vsel %vm228_vm1, 1.0, %v1040_v28  ;;  %vm239_vm10 = vmand %vm205_vm8, %vm223_vm9 }
  0x5d   : > { %v734_v5 = vsel %vm239_vm10, 1.0, %v1040_v28 }
 0x11c   : > { %v808_v6 = vpop.f32.mrb[0].mxu0 }
 0x11d   : > { %v371_v7 = vpop.f32.mrb[1].mxu0 }
 0x11e   : > { %v862_v8 = vpack.c.bf16 %v808_v6, %v371_v7 }
 0x120   : > { %v811_v9 = vpop.f32.mrb[2].mxu0  ;;  %863 = vmatprep.subr.bf16.mxu0 %v862_v8  ;;  %878 = vmatprep.subr.bf16.mxu1 %v862_v8 }
 0x121   : > { %v381_v10 = vpop.f32.mrb[3].mxu0  ;;  %865 = vmatpush3.bf16.msra.mxu0 %v862_v8  ;;  %882 = vmatpush3.bf16.msra.mxu1 %v862_v8 }
 0x122   : > { %v866_v11 = vpack.c.bf16 %v811_v9, %v381_v10 }
 0x124   : > { %v814_v12 = vpop.f32.mrb[4].mxu0  ;;  %867 = vmatprep.subr.bf16.mxu0 %v866_v11  ;;  %879 = vmatprep.subr.bf16.mxu1 %v866_v11 }
 0x125   : > { %v391_v13 = vpop.f32.mrb[5].mxu0  ;;  %869 = vmatpush3.bf16.msra.mxu0 %v866_v11  ;;  %883 = vmatpush3.bf16.msra.mxu1 %v866_v11 }
 0x126   : > { %v870_v14 = vpack.c.bf16 %v814_v12, %v391_v13 }
 0x128   : > { %v817_v15 = vpop.f32.mrb[6].mxu0  ;;  %871 = vmatprep.subr.bf16.mxu0 %v870_v14  ;;  %880 = vmatprep.subr.bf16.mxu1 %v870_v14 }
 0x129   : > { %v401_v16 = vpop.f32.mrb[7].mxu0  ;;  %873 = vmatpush3.bf16.msra.mxu0 %v870_v14  ;;  %884 = vmatpush3.bf16.msra.mxu1 %v870_v14 }
 0x12a   : > { %v874_v17 = vpack.c.bf16 %v817_v15, %v401_v16 }
 0x12c   : > { %875 = vmatprep.subr.bf16.mxu0 %v874_v17  ;;  %881 = vmatprep.subr.bf16.mxu1 %v874_v17 }
 0x12d   : > { %877 = vmatpush3.bf16.msra.mxu0 %v874_v17  ;;  %885 = vmatpush3.bf16.msra.mxu1 %v874_v17 }
 0x130   : > { %844 = vmatmul.mubr.msk.f32.vlgmr.msra.gmra.mrb[0].mxu1 %vm410_vm11, %v1208_v32  ;;  %835 = vmatmul.mubr.msk.f32.vlgmr.msra.gmra.mrb[8].mxu0 %vm410_vm11, %v1235_v44 }
 0x131   : > { %846 = vmatprep.mubr.msk.f32.mxu1 %vm410_vm11, %v1216_v37  ;;  %837 = vmatprep.mubr.msk.f32.mxu0 %vm410_vm11, %v1253_v57 }
 0x134   : > { %847 = vmatmul.mubr.msk.f32.gmra.mrb[2].mxu1 %vm410_vm11, %v1224_v41  ;;  %838 = vmatmul.mubr.msk.f32.gmra.mrb[10].mxu0 %vm410_vm11, %v722_v59 }
 0x135   : > { %849 = vmatprep.mubr.msk.f32.mxu1 %vm410_vm11, %v1240_v47  ;;  %840 = vmatprep.mubr.msk.f32.mxu0 %vm410_vm11, %v723_v2 }
 0x138   : > { %850 = vmatmul.mubr.msk.f32.gmra.mrb[4].mxu1 %vm410_vm11, %v1246_v51  ;;  %841 = vmatmul.mubr.msk.f32.gmra.mrb[12].mxu0 %vm410_vm11, %v724_v4 }
 0x139   : > { %852 = vmatprep.mubr.msk.f32.mxu1 %vm410_vm11, %v731_v61 }
 0x13c   : > { %853 = vmatmul.mubr.msk.f32.gmra.mrb[6].mxu1 %vm410_vm11, %v732_v0 }
 0x13d   : > { %855 = vmatprep.mubr.msk.f32.mxu1 %vm410_vm11, %v733_v1 }
 0x140   : > { %856 = vmatmul.mubr.msk.f32.gmra.mrb[8].mxu1 %vm410_vm11, %v734_v5 }
 0x203   : > { %v845_v18 = vpop.f32.mrb[0].mxu1  ;;  %v836_v19 = vpop.f32.mrb[8].mxu0 }
 0x204   : > { %612 = vst.msk [vmem:[%s1299_s25 + $0x38] sm:$0xff] %vm604_vm12, %v845_v18  ;;  %v555_v20 = vpop.f32.mrb[1].mxu1  ;;  %606 = vst.msk [vmem:[%s1299_s25 + $0x8] sm:$0xff] %vm604_vm12, %v836_v19  ;;  %v525_v21 = vpop.f32.mrb[9].mxu0 }
 0x205   : > { %611 = vst.msk [vmem:[%s1299_s25 + $0x30] sm:$0xff] %vm604_vm12, %v555_v20  ;;  %605 = vst.msk [vmem:[%s1299_s25] sm:$0xff] %vm604_vm12, %v525_v21 }
 0x207   : > { %v848_v22 = vpop.f32.mrb[2].mxu1  ;;  %v839_v23 = vpop.f32.mrb[10].mxu0 }
 0x208   : > { %614 = vst.msk [vmem:[%s1299_s25 + $0x48] sm:$0xff] %vm604_vm12, %v848_v22  ;;  %v565_v24 = vpop.f32.mrb[3].mxu1  ;;  %608 = vst.msk [vmem:[%s1299_s25 + $0x18] sm:$0xff] %vm604_vm12, %v839_v23  ;;  %v535_v25 = vpop.f32.mrb[11].mxu0 }
 0x209   : > { %613 = vst.msk [vmem:[%s1299_s25 + $0x40] sm:$0xff] %vm604_vm12, %v565_v24  ;;  %607 = vst.msk [vmem:[%s1299_s25 + $0x10] sm:$0xff] %vm604_vm12, %v535_v25 }
 0x20b   : > { %v851_v26 = vpop.f32.mrb[4].mxu1  ;;  %v842_v27 = vpop.f32.mrb[12].mxu0 }
 0x20c   : > { %616 = vst.msk [vmem:[%s1299_s25 + $0x58] sm:$0xff] %vm604_vm12, %v851_v26  ;;  %v575_v28 = vpop.f32.mrb[5].mxu1  ;;  %610 = vst.msk [vmem:[%s1299_s25 + $0x28] sm:$0xff] %vm604_vm12, %v842_v27  ;;  %v545_v29 = vpop.f32.mrb[13].mxu0 }
 0x20d   : > { %615 = vst.msk [vmem:[%s1299_s25 + $0x50] sm:$0xff] %vm604_vm12, %v575_v28  ;;  %609 = vst.msk [vmem:[%s1299_s25 + $0x20] sm:$0xff] %vm604_vm12, %v545_v29 }
 0x20f   : > { %v854_v30 = vpop.f32.mrb[6].mxu1 }
 0x210   : > { %618 = vst.msk [vmem:[%s1299_s25 + $0x68] sm:$0xff] %vm604_vm12, %v854_v30  ;;  %v585_v31 = vpop.f32.mrb[7].mxu1 }
 0x211   : > { %617 = vst.msk [vmem:[%s1299_s25 + $0x60] sm:$0xff] %vm604_vm12, %v585_v31 }
 0x213   : > { %v857_v32 = vpop.f32.mrb[8].mxu1 }
 0x214   : > { %620 = vst.msk [vmem:[%s1299_s25 + $0x78] sm:$0xff] %vm604_vm12, %v857_v32  ;;  %v595_v33 = vpop.f32.mrb[9].mxu1 }
 0x215   : > { %619 = vst.msk [vmem:[%s1299_s25 + $0x70] sm:$0xff] %vm604_vm12, %v595_v33 }
 0x216   : > { %981 = shalt.err (!%p978_p2)
}
 0x217   : > { %s982_s14 = scalar_lea.hbm %s1334_s3, 2048  ;;  %s986_s21 = scalar_lea.hbm %s1385_s1, 4096 }
 0x218   : > { %p983_p4 = scmp.ne.s32.totalorder %s1334_s3, %s982_s14  ;;  %p987_p9 = scmp.lt.u32.totalorder %s1334_s3, %s1385_s1 }
 0x219   : > { %p988_p1 = scmp.lt.u32.totalorder %s986_s21, %s982_s14  ;;  %p990_p6 = scmp.lt.u32.totalorder %s982_s14, %s1334_s3 }
 0x21a   : > { %p984_p5 = pnand %p983_p4, %p1392_p11 }
 0x21b   : > { %p989_p3 = por %p988_p1, %p987_p9 }
 0x21c   : > { %p985_p7 = pneg %p984_p5 }
 0x21d   : > { %p991_p12 = por %p990_p6, %p989_p3 }
 0x21f   : > { %p992_p13 = pnand %p991_p12, %p985_p7 }
 0x221   : > { %995 = shalt.err (!%p992_p13)
}
 0x222   : > { %s1042_s26 = smov 128   ;;  %s1043_s30 = smov 8  }
 0x223   : > { %888 = dma.vmem_to_hbm [thread:$0]  (%p1392_p11), %s1336_s28, 2048, %s1334_s3, %s622_s10, %s1042_s26, %s1042_s26, %s1043_s30  }
 0x224 PF: > { %s650_s17 = sand.u32 1, %s1022_s6   ;;  %p1393_p8 = scmp.ne.s32.totalorder %s1390_s19, 0 }
 0x225   : > { %p1394_p10 = scmp.ge.s32.totalorder %s1034_s9, 2  ;;  %s651_s25 = scalar_lea.sflag [#allocation4], %s650_s17 }
 0x227   : > { %p895_p0 = pnand %p1394_p10, %p1393_p8 }
 0x229   : > { %1017 = dma.done.wait (!%p895_p0), %s651_s25, 2048  }
 0x22a   : > { %1019 = vsyncadd (!%p895_p0), %s651_s25, 4294965248  ;;  %p14_p2 = scmp.ge.s32.totalorder %s1079_s12, 4   ;;  %s1395_s6 = smov %s1026_s7 }
 0x22b   : > { %s1396_s7 = smov %s1030_s8  ;;  %s1397_s8 = smov %s1091_s15 }
 0x22c   : > { %s1398_s9 = smov %s1079_s12  ;;  %16 = sbr.rel (!%p14_p2) target bundleno = 5 (0x5), region = 69 }
 0x233   :  { %656 = vsyncpa [#allocation3], 1 }
 0x234   :  { %658 = vsyncpa [#allocation3 + $0x1], 1 }
 0x235   :  { %659 = vsyncpa [#allocation4], 1 }
 0x236   :  { %661 = vsyncpa [#allocation4 + $0x1], 1 }

</bundles_post_ra>
